<compile_context>
chip_gen: v6e
topology: v6e:2x2x1
jax: 0.10.0
libtpu: 0.0.40
codegen_flags: <defaults>
</compile_context>

<pallas_src>
import jax
import jax.numpy as jnp
from jax.experimental import pallas as pl
from jax.experimental.pallas import tpu as pltpu

K = 3                            # depthwise conv kernel size (padding="same")
_HALO = 8                        # sublane-aligned column offset of interior in scratch
_GELU_A = 0.7978845608028654     # sqrt(2/pi)
_GELU_B = 0.044715 * 0.7978845608028654


def residual_convmixer_kernel(x_ref, top_ref, bot_ref, p_ref, o_ref, pad_ref):
    """One (batch, row-strip) tile, channels-last.

    x_ref   : VMEM (1, TH, W, C)        input row strip
    top_ref : VMEM (1, 1, W, C)         row above the strip (clamped at image top)
    bot_ref : VMEM (1, 1, W, C)         row below the strip (clamped at image bottom)
    p_ref   : VMEM (12, 1, C) f32       [9 taps, conv bias, 0.5*bn_scale, bn_shift]
    o_ref   : VMEM (1, TH, W, C)        output row strip
    pad_ref : VMEM (TH+2, W+2*_HALO, C) f32 scratch holding the zero-halo strip
    """
    _, TH, Ww, C = x_ref.shape
    i = pl.program_id(1)
    last = pl.num_programs(1) - 1

    # ---- Build the halo strip in VMEM scratch --------------------------------
    # Only the halo region actually read by the 3x3 taps is written each step:
    # the two border columns (left/right image edge, always zero) and the top /
    # bottom halo rows (neighbor rows, zero at the image top/bottom).
    zcol = jnp.zeros((TH + 2, 1, C), jnp.float32)
    pad_ref[:, pl.ds(_HALO - 1, 1), :] = zcol
    pad_ref[:, pl.ds(_HALO + Ww, 1), :] = zcol

    # Interior rows straight from the input tile (no separate full-tile temp).
    pad_ref[pl.ds(1, TH), pl.ds(_HALO, Ww), :] = x_ref[0].astype(jnp.float32)

    top = jnp.where(i == 0, 0.0, top_ref[0].astype(jnp.float32))
    pad_ref[pl.ds(0, 1), pl.ds(_HALO, Ww), :] = top
    bot = jnp.where(i == last, 0.0, bot_ref[0].astype(jnp.float32))
    pad_ref[pl.ds(TH + 1, 1), pl.ds(_HALO, Ww), :] = bot

    # Per-channel parameter lane vectors (each (1, C)).
    bias = p_ref[K * K + 0]
    bn_scale_half = p_ref[K * K + 1]     # 0.5 * gamma / sqrt(var + eps), folded at pack time
    bn_shift = p_ref[K * K + 2]

    # ---- 3x3 depthwise convolution: 9 shifted multiply-adds ------------------
    acc = pad_ref[pl.ds(0, TH), pl.ds(_HALO - 1, Ww), :] * p_ref[0]
    for t in range(1, K * K):
        dy, dx = divmod(t, K)
        acc = acc + pad_ref[pl.ds(dy, TH), pl.ds(_HALO - 1 + dx, Ww), :] * p_ref[t]
    y = acc + bias

    # ---- GELU (tanh approx, constants folded) + BatchNorm affine -------------
    # gelu(y) * g + b == y * (1 + tanh(y*(A + B*y^2))) * (0.5*g) + b
    t_arg = y * (_GELU_A + _GELU_B * (y * y))
    y = y * (1.0 + jnp.tanh(t_arg)) * bn_scale_half + bn_shift

    # ---- Residual add (residual read back from the scratch interior) ---------
    o_ref[0] = (y + pad_ref[pl.ds(1, TH), pl.ds(_HALO, Ww), :]).astype(o_ref.dtype)


def residual_convmixer(x, params, row_tile=8):
    """x: (B, H, W, C) activations (f32 or bf16); params: (12, 1, C) f32."""
    B, H, W, C = x.shape

    # Largest divisor of H not exceeding row_tile (keeps every tile full-size).
    th = min(row_tile, H)
    while H % th:
        th -= 1
    n_h = H // th

    return pl.pallas_call(
        residual_convmixer_kernel,
        out_shape=jax.ShapeDtypeStruct((B, H, W, C), x.dtype),
        grid=(B, n_h),
        in_specs=[
            # Main row strip.
            pl.BlockSpec((1, th, W, C), lambda b, i: (b, i, 0, 0)),
            # 1-row halos: block size 1 in H, so the returned index is an element
            # row offset; clamped so the DMA stays in bounds (the boundary rows
            # are overwritten with zeros inside the kernel).
            pl.BlockSpec((1, 1, W, C),
                         lambda b, i: (b, jnp.maximum(i * th - 1, 0), 0, 0)),
            pl.BlockSpec((1, 1, W, C),
                         lambda b, i: (b, jnp.minimum((i + 1) * th, H - 1), 0, 0)),
            # Per-channel parameters (resident across the grid).
            pl.BlockSpec((K * K + 3, 1, C), lambda b, i: (0, 0, 0)),
        ],
        out_specs=pl.BlockSpec((1, th, W, C), lambda b, i: (b, i, 0, 0)),
        scratch_shapes=[pltpu.VMEM((th + 2, W + 2 * _HALO, C), jnp.float32)],
        compiler_params=pltpu.CompilerParams(
            dimension_semantics=("parallel", "parallel"),
        ),
    )(x, x, x, params)


def pack_params(w, bias, bn_scale, bn_shift):
    """w: (C, 3, 3) depthwise taps; others: (C,).  Returns (12, 1, C) f32.

    Folds GELU's leading 0.5 into the BN scale row.
    """
    C = bias.shape[0]
    rows = jnp.concatenate(
        [w.reshape(C, K * K).T,
         bias[None, :],
         (0.5 * bn_scale)[None, :],
         bn_shift[None, :]],
        axis=0,
    )
    return rows.reshape(K * K + 3, 1, C).astype(jnp.float32)


def _reference(x, w, bias, bn_scale, bn_shift):
    """Pure-JAX NHWC reference of fn(x) + x (eval-mode BN)."""
    B, H, W, C = x.shape
    xp = jnp.pad(x, ((0, 0), (1, 1), (1, 1), (0, 0)))
    y = jnp.zeros_like(x)
    for dy in range(K):
        for dx in range(K):
            y = y + xp[:, dy:dy + H, dx:dx + W, :] * w[:, dy, dx][None, None, None, :]
    y = y + bias[None, None, None, :]
    y = 0.5 * y * (1.0 + jnp.tanh(_GELU_A * (y + 0.044715 * y ** 3)))
    y = y * bn_scale[None, None, None, :] + bn_shift[None, None, None, :]
    return y + x


if __name__ == "__main__":
    B, C, H, W = 2, 4, 16, 16

    key = jax.random.PRNGKey(0)
    k_x, k_w, k_b, k_g, k_be, k_m, k_v = jax.random.split(key, 7)

    # Channels-last activations; NCHW callers transpose once outside the kernel.
    x = jax.random.normal(k_x, (B, H, W, C), jnp.float32)

    w = jax.random.normal(k_w, (C, K, K), jnp.float32) * 0.2        # Conv2d weight (C,1,3,3) squeezed
    bias = jax.random.normal(k_b, (C,), jnp.float32) * 0.1          # Conv2d bias
    gamma = 1.0 + 0.1 * jax.random.normal(k_g, (C,), jnp.float32)   # BN weight
    beta = 0.1 * jax.random.normal(k_be, (C,), jnp.float32)         # BN bias
    run_mean = 0.1 * jax.random.normal(k_m, (C,), jnp.float32)      # BN running_mean
    run_var = 1.0 + 0.1 * jax.random.uniform(k_v, (C,), jnp.float32)  # BN running_var
    eps = 1e-5

    # Fold eval-mode BatchNorm into a per-channel affine.
    bn_scale = gamma / jnp.sqrt(run_var + eps)
    bn_shift = beta - run_mean * bn_scale

    params = pack_params(w, bias, bn_scale, bn_shift)

    out = jax.block_until_ready(residual_convmixer(x, params, row_tile=8))
    ref = _reference(x, w, bias, bn_scale, bn_shift)

    assert out.shape == (B, H, W, C)
    assert jnp.allclose(out, ref, atol=1e-5, rtol=1e-5), (
        f"max err {jnp.max(jnp.abs(out - ref))}"
    )

    print("KERNEL_OK")
</pallas_src>

<mosaic_0001>
module attributes {stable_mosaic.version = 11 : i64} {
  func.func @residual_convmixer_kernel(%arg0: i32, %arg1: i32, %arg2: memref<1x8x16x4xf32, #tpu.memory_space<vmem>>, %arg3: memref<1x1x16x4xf32, #tpu.memory_space<vmem>>, %arg4: memref<1x1x16x4xf32, #tpu.memory_space<vmem>>, %arg5: memref<12x1x4xf32, #tpu.memory_space<vmem>>, %arg6: memref<1x8x16x4xf32, #tpu.memory_space<vmem>>, %arg7: memref<10x32x4xf32, #tpu.memory_space<vmem>>) attributes {dimension_semantics = [#tpu.dimension_semantics<parallel>, #tpu.dimension_semantics<parallel>], iteration_bounds = array<i64: 2, 2>, scalar_prefetch = 0 : i64, scratch_operands = 1 : i64, tpu.core_type = #tpu.core_type<tc>, window_params = [{transform_indices = @transform_0, window_bounds = array<i64: 1, 8, 16, 4>}, {transform_indices = @transform_1, window_bounds = array<i64: 1, 1, 16, 4>}, {transform_indices = @transform_2, window_bounds = array<i64: 1, 1, 16, 4>}, {pipeline_mode = #tpu.pipeline_mode<synchronous>, transform_indices = @transform_3, window_bounds = array<i64: 12, 1, 4>}, {transform_indices = @transform_4, window_bounds = array<i64: 1, 8, 16, 4>}]} {
    %cst = arith.constant 0.000000e+00 : f32
    %0 = vector.broadcast %cst : f32 to vector<10x1x4xf32>
    %c0 = arith.constant 0 : index
    %c7 = arith.constant 7 : index
    %c0_0 = arith.constant 0 : index
    %1 = vector.load %arg7[%c0, %c7, %c0_0] : memref<10x32x4xf32, #tpu.memory_space<vmem>>, vector<10x1x4xf32>
    tpu.vector_store %arg7[%c0, %c7, %c0_0], %0 {strides = array<i32>} : memref<10x32x4xf32, #tpu.memory_space<vmem>>, vector<10x1x4xf32>,
    %c0_1 = arith.constant 0 : index
    %c24 = arith.constant 24 : index
    %c0_2 = arith.constant 0 : index
    %2 = vector.load %arg7[%c0_1, %c24, %c0_2] : memref<10x32x4xf32, #tpu.memory_space<vmem>>, vector<10x1x4xf32>
    tpu.vector_store %arg7[%c0_1, %c24, %c0_2], %0 {strides = array<i32>} : memref<10x32x4xf32, #tpu.memory_space<vmem>>, vector<10x1x4xf32>,
    %c0_3 = arith.constant 0 : index
    %c0_4 = arith.constant 0 : index
    %c0_5 = arith.constant 0 : index
    %c0_6 = arith.constant 0 : index
    %3 = vector.load %arg2[%c0_3, %c0_4, %c0_5, %c0_6] : memref<1x8x16x4xf32, #tpu.memory_space<vmem>>, vector<1x8x16x4xf32>
    %4 = vector.shape_cast %3 : vector<1x8x16x4xf32> to vector<8x16x4xf32>
    %c1 = arith.constant 1 : index
    %c8 = arith.constant 8 : index
    %c0_7 = arith.constant 0 : index
    %5 = vector.load %arg7[%c1, %c8, %c0_7] : memref<10x32x4xf32, #tpu.memory_space<vmem>>, vector<8x16x4xf32>
    tpu.vector_store %arg7[%c1, %c8, %c0_7], %4 {strides = array<i32>} : memref<10x32x4xf32, #tpu.memory_space<vmem>>, vector<8x16x4xf32>,
    %c0_i32 = arith.constant 0 : i32
    %6 = arith.cmpi eq, %arg1, %c0_i32 : i32
    %c0_8 = arith.constant 0 : index
    %c0_9 = arith.constant 0 : index
    %c0_10 = arith.constant 0 : index
    %c0_11 = arith.constant 0 : index
    %7 = vector.load %arg3[%c0_8, %c0_9, %c0_10, %c0_11] : memref<1x1x16x4xf32, #tpu.memory_space<vmem>>, vector<1x1x16x4xf32>
    %8 = vector.shape_cast %7 : vector<1x1x16x4xf32> to vector<1x16x4xf32>
    %cst_12 = arith.constant 0.000000e+00 : f32
    %9 = vector.broadcast %cst_12 : f32 to vector<1x16x4xf32>
    %10 = arith.select %6, %9, %8 : vector<1x16x4xf32>
    %c0_13 = arith.constant 0 : index
    %c8_14 = arith.constant 8 : index
    %c0_15 = arith.constant 0 : index
    %11 = vector.load %arg7[%c0_13, %c8_14, %c0_15] : memref<10x32x4xf32, #tpu.memory_space<vmem>>, vector<1x16x4xf32>
    tpu.vector_store %arg7[%c0_13, %c8_14, %c0_15], %10 {strides = array<i32>} : memref<10x32x4xf32, #tpu.memory_space<vmem>>, vector<1x16x4xf32>,
    %c1_i32 = arith.constant 1 : i32
    %12 = arith.cmpi eq, %arg1, %c1_i32 : i32
    %c0_16 = arith.constant 0 : index
    %c0_17 = arith.constant 0 : index
    %c0_18 = arith.constant 0 : index
    %c0_19 = arith.constant 0 : index
    %13 = vector.load %arg4[%c0_16, %c0_17, %c0_18, %c0_19] : memref<1x1x16x4xf32, #tpu.memory_space<vmem>>, vector<1x1x16x4xf32>
    %14 = vector.shape_cast %13 : vector<1x1x16x4xf32> to vector<1x16x4xf32>
    %cst_20 = arith.constant 0.000000e+00 : f32
    %15 = vector.broadcast %cst_20 : f32 to vector<1x16x4xf32>
    %16 = arith.select %12, %15, %14 : vector<1x16x4xf32>
    %c9 = arith.constant 9 : index
    %c8_21 = arith.constant 8 : index
    %c0_22 = arith.constant 0 : index
    %17 = vector.load %arg7[%c9, %c8_21, %c0_22] : memref<10x32x4xf32, #tpu.memory_space<vmem>>, vector<1x16x4xf32>
    tpu.vector_store %arg7[%c9, %c8_21, %c0_22], %16 {strides = array<i32>} : memref<10x32x4xf32, #tpu.memory_space<vmem>>, vector<1x16x4xf32>,
    %c9_23 = arith.constant 9 : index
    %c0_24 = arith.constant 0 : index
    %c0_25 = arith.constant 0 : index
    %18 = vector.load %arg5[%c9_23, %c0_24, %c0_25] : memref<12x1x4xf32, #tpu.memory_space<vmem>>, vector<1x1x4xf32>
    %19 = vector.shape_cast %18 : vector<1x1x4xf32> to vector<1x4xf32>
    %c10 = arith.constant 10 : index
    %c0_26 = arith.constant 0 : index
    %c0_27 = arith.constant 0 : index
    %20 = vector.load %arg5[%c10, %c0_26, %c0_27] : memref<12x1x4xf32, #tpu.memory_space<vmem>>, vector<1x1x4xf32>
    %21 = vector.shape_cast %20 : vector<1x1x4xf32> to vector<1x4xf32>
    %c11 = arith.constant 11 : index
    %c0_28 = arith.constant 0 : index
    %c0_29 = arith.constant 0 : index
    %22 = vector.load %arg5[%c11, %c0_28, %c0_29] : memref<12x1x4xf32, #tpu.memory_space<vmem>>, vector<1x1x4xf32>
    %23 = vector.shape_cast %22 : vector<1x1x4xf32> to vector<1x4xf32>
    %c0_30 = arith.constant 0 : index
    %c7_31 = arith.constant 7 : index
    %c0_32 = arith.constant 0 : index
    %24 = vector.load %arg7[%c0_30, %c7_31, %c0_32] : memref<10x32x4xf32, #tpu.memory_space<vmem>>, vector<8x16x4xf32>
    %c0_33 = arith.constant 0 : index
    %c0_34 = arith.constant 0 : index
    %c0_35 = arith.constant 0 : index
    %25 = vector.load %arg5[%c0_33, %c0_34, %c0_35] : memref<12x1x4xf32, #tpu.memory_space<vmem>>, vector<1x1x4xf32>
    %26 = vector.shape_cast %25 : vector<1x1x4xf32> to vector<1x4xf32>
    %27 = vector.shape_cast %26 : vector<1x4xf32> to vector<1x1x4xf32>
    %28 = vector.broadcast %27 : vector<1x1x4xf32> to vector<8x16x4xf32>
    %29 = arith.mulf %24, %28 : vector<8x16x4xf32>
    %c0_36 = arith.constant 0 : index
    %c8_37 = arith.constant 8 : index
    %c0_38 = arith.constant 0 : index
    %30 = vector.load %arg7[%c0_36, %c8_37, %c0_38] : memref<10x32x4xf32, #tpu.memory_space<vmem>>, vector<8x16x4xf32>
    %c1_39 = arith.constant 1 : index
    %c0_40 = arith.constant 0 : index
    %c0_41 = arith.constant 0 : index
    %31 = vector.load %arg5[%c1_39, %c0_40, %c0_41] : memref<12x1x4xf32, #tpu.memory_space<vmem>>, vector<1x1x4xf32>
    %32 = vector.shape_cast %31 : vector<1x1x4xf32> to vector<1x4xf32>
    %33 = vector.shape_cast %32 : vector<1x4xf32> to vector<1x1x4xf32>
    %34 = vector.broadcast %33 : vector<1x1x4xf32> to vector<8x16x4xf32>
    %35 = arith.mulf %30, %34 : vector<8x16x4xf32>
    %36 = arith.addf %29, %35 : vector<8x16x4xf32>
    %c0_42 = arith.constant 0 : index
    %c9_43 = arith.constant 9 : index
    %c0_44 = arith.constant 0 : index
    %37 = vector.load %arg7[%c0_42, %c9_43, %c0_44] : memref<10x32x4xf32, #tpu.memory_space<vmem>>, vector<8x16x4xf32>
    %c2 = arith.constant 2 : index
    %c0_45 = arith.constant 0 : index
    %c0_46 = arith.constant 0 : index
    %38 = vector.load %arg5[%c2, %c0_45, %c0_46] : memref<12x1x4xf32, #tpu.memory_space<vmem>>, vector<1x1x4xf32>
    %39 = vector.shape_cast %38 : vector<1x1x4xf32> to vector<1x4xf32>
    %40 = vector.shape_cast %39 : vector<1x4xf32> to vector<1x1x4xf32>
    %41 = vector.broadcast %40 : vector<1x1x4xf32> to vector<8x16x4xf32>
    %42 = arith.mulf %37, %41 : vector<8x16x4xf32>
    %43 = arith.addf %36, %42 : vector<8x16x4xf32>
    %c1_47 = arith.constant 1 : index
    %c7_48 = arith.constant 7 : index
    %c0_49 = arith.constant 0 : index
    %44 = vector.load %arg7[%c1_47, %c7_48, %c0_49] : memref<10x32x4xf32, #tpu.memory_space<vmem>>, vector<8x16x4xf32>
    %c3 = arith.constant 3 : index
    %c0_50 = arith.constant 0 : index
    %c0_51 = arith.constant 0 : index
    %45 = vector.load %arg5[%c3, %c0_50, %c0_51] : memref<12x1x4xf32, #tpu.memory_space<vmem>>, vector<1x1x4xf32>
    %46 = vector.shape_cast %45 : vector<1x1x4xf32> to vector<1x4xf32>
    %47 = vector.shape_cast %46 : vector<1x4xf32> to vector<1x1x4xf32>
    %48 = vector.broadcast %47 : vector<1x1x4xf32> to vector<8x16x4xf32>
    %49 = arith.mulf %44, %48 : vector<8x16x4xf32>
    %50 = arith.addf %43, %49 : vector<8x16x4xf32>
    %c1_52 = arith.constant 1 : index
    %c8_53 = arith.constant 8 : index
    %c0_54 = arith.constant 0 : index
    %51 = vector.load %arg7[%c1_52, %c8_53, %c0_54] : memref<10x32x4xf32, #tpu.memory_space<vmem>>, vector<8x16x4xf32>
    %c4 = arith.constant 4 : index
    %c0_55 = arith.constant 0 : index
    %c0_56 = arith.constant 0 : index
    %52 = vector.load %arg5[%c4, %c0_55, %c0_56] : memref<12x1x4xf32, #tpu.memory_space<vmem>>, vector<1x1x4xf32>
    %53 = vector.shape_cast %52 : vector<1x1x4xf32> to vector<1x4xf32>
    %54 = vector.shape_cast %53 : vector<1x4xf32> to vector<1x1x4xf32>
    %55 = vector.broadcast %54 : vector<1x1x4xf32> to vector<8x16x4xf32>
    %56 = arith.mulf %51, %55 : vector<8x16x4xf32>
    %57 = arith.addf %50, %56 : vector<8x16x4xf32>
    %c1_57 = arith.constant 1 : index
    %c9_58 = arith.constant 9 : index
    %c0_59 = arith.constant 0 : index
    %58 = vector.load %arg7[%c1_57, %c9_58, %c0_59] : memref<10x32x4xf32, #tpu.memory_space<vmem>>, vector<8x16x4xf32>
    %c5 = arith.constant 5 : index
    %c0_60 = arith.constant 0 : index
    %c0_61 = arith.constant 0 : index
    %59 = vector.load %arg5[%c5, %c0_60, %c0_61] : memref<12x1x4xf32, #tpu.memory_space<vmem>>, vector<1x1x4xf32>
    %60 = vector.shape_cast %59 : vector<1x1x4xf32> to vector<1x4xf32>
    %61 = vector.shape_cast %60 : vector<1x4xf32> to vector<1x1x4xf32>
    %62 = vector.broadcast %61 : vector<1x1x4xf32> to vector<8x16x4xf32>
    %63 = arith.mulf %58, %62 : vector<8x16x4xf32>
    %64 = arith.addf %57, %63 : vector<8x16x4xf32>
    %c2_62 = arith.constant 2 : index
    %c7_63 = arith.constant 7 : index
    %c0_64 = arith.constant 0 : index
    %65 = vector.load %arg7[%c2_62, %c7_63, %c0_64] : memref<10x32x4xf32, #tpu.memory_space<vmem>>, vector<8x16x4xf32>
    %c6 = arith.constant 6 : index
    %c0_65 = arith.constant 0 : index
    %c0_66 = arith.constant 0 : index
    %66 = vector.load %arg5[%c6, %c0_65, %c0_66] : memref<12x1x4xf32, #tpu.memory_space<vmem>>, vector<1x1x4xf32>
    %67 = vector.shape_cast %66 : vector<1x1x4xf32> to vector<1x4xf32>
    %68 = vector.shape_cast %67 : vector<1x4xf32> to vector<1x1x4xf32>
    %69 = vector.broadcast %68 : vector<1x1x4xf32> to vector<8x16x4xf32>
    %70 = arith.mulf %65, %69 : vector<8x16x4xf32>
    %71 = arith.addf %64, %70 : vector<8x16x4xf32>
    %c2_67 = arith.constant 2 : index
    %c8_68 = arith.constant 8 : index
    %c0_69 = arith.constant 0 : index
    %72 = vector.load %arg7[%c2_67, %c8_68, %c0_69] : memref<10x32x4xf32, #tpu.memory_space<vmem>>, vector<8x16x4xf32>
    %c7_70 = arith.constant 7 : index
    %c0_71 = arith.constant 0 : index
    %c0_72 = arith.constant 0 : index
    %73 = vector.load %arg5[%c7_70, %c0_71, %c0_72] : memref<12x1x4xf32, #tpu.memory_space<vmem>>, vector<1x1x4xf32>
    %74 = vector.shape_cast %73 : vector<1x1x4xf32> to vector<1x4xf32>
    %75 = vector.shape_cast %74 : vector<1x4xf32> to vector<1x1x4xf32>
    %76 = vector.broadcast %75 : vector<1x1x4xf32> to vector<8x16x4xf32>
    %77 = arith.mulf %72, %76 : vector<8x16x4xf32>
    %78 = arith.addf %71, %77 : vector<8x16x4xf32>
    %c2_73 = arith.constant 2 : index
    %c9_74 = arith.constant 9 : index
    %c0_75 = arith.constant 0 : index
    %79 = vector.load %arg7[%c2_73, %c9_74, %c0_75] : memref<10x32x4xf32, #tpu.memory_space<vmem>>, vector<8x16x4xf32>
    %c8_76 = arith.constant 8 : index
    %c0_77 = arith.constant 0 : index
    %c0_78 = arith.constant 0 : index
    %80 = vector.load %arg5[%c8_76, %c0_77, %c0_78] : memref<12x1x4xf32, #tpu.memory_space<vmem>>, vector<1x1x4xf32>
    %81 = vector.shape_cast %80 : vector<1x1x4xf32> to vector<1x4xf32>
    %82 = vector.shape_cast %81 : vector<1x4xf32> to vector<1x1x4xf32>
    %83 = vector.broadcast %82 : vector<1x1x4xf32> to vector<8x16x4xf32>
    %84 = arith.mulf %79, %83 : vector<8x16x4xf32>
    %85 = arith.addf %78, %84 : vector<8x16x4xf32>
    %86 = vector.shape_cast %19 : vector<1x4xf32> to vector<1x1x4xf32>
    %87 = vector.broadcast %86 : vector<1x1x4xf32> to vector<8x16x4xf32>
    %88 = arith.addf %85, %87 : vector<8x16x4xf32>
    %89 = arith.mulf %88, %88 : vector<8x16x4xf32>
    %cst_79 = arith.constant 0.0356774069 : f32
    %90 = vector.broadcast %cst_79 : f32 to vector<8x16x4xf32>
    %91 = arith.mulf %90, %89 : vector<8x16x4xf32>
    %cst_80 = arith.constant 0.797884583 : f32
    %92 = vector.broadcast %cst_80 : f32 to vector<8x16x4xf32>
    %93 = arith.addf %92, %91 : vector<8x16x4xf32>
    %94 = arith.mulf %88, %93 : vector<8x16x4xf32>
    %95 = math.tanh %94 : vector<8x16x4xf32>
    %cst_81 = arith.constant 1.000000e+00 : f32
    %96 = vector.broadcast %cst_81 : f32 to vector<8x16x4xf32>
    %97 = arith.addf %96, %95 : vector<8x16x4xf32>
    %98 = arith.mulf %88, %97 : vector<8x16x4xf32>
    %99 = vector.shape_cast %21 : vector<1x4xf32> to vector<1x1x4xf32>
    %100 = vector.broadcast %99 : vector<1x1x4xf32> to vector<8x16x4xf32>
    %101 = arith.mulf %98, %100 : vector<8x16x4xf32>
    %102 = vector.shape_cast %23 : vector<1x4xf32> to vector<1x1x4xf32>
    %103 = vector.broadcast %102 : vector<1x1x4xf32> to vector<8x16x4xf32>
    %104 = arith.addf %101, %103 : vector<8x16x4xf32>
    %c1_82 = arith.constant 1 : index
    %c8_83 = arith.constant 8 : index
    %c0_84 = arith.constant 0 : index
    %105 = vector.load %arg7[%c1_82, %c8_83, %c0_84] : memref<10x32x4xf32, #tpu.memory_space<vmem>>, vector<8x16x4xf32>
    %106 = arith.addf %104, %105 : vector<8x16x4xf32>
    %c0_85 = arith.constant 0 : index
    %c0_86 = arith.constant 0 : index
    %c0_87 = arith.constant 0 : index
    %c0_88 = arith.constant 0 : index
    %107 = vector.load %arg6[%c0_85, %c0_86, %c0_87, %c0_88] : memref<1x8x16x4xf32, #tpu.memory_space<vmem>>, vector<1x8x16x4xf32>
    %108 = vector.shape_cast %107 : vector<1x8x16x4xf32> to vector<8x16x4xf32>
    %109 = vector.shape_cast %106 : vector<8x16x4xf32> to vector<1x8x16x4xf32>
    tpu.vector_store %arg6[%c0_85, %c0_86, %c0_87, %c0_88], %109 {strides = array<i32>} : memref<1x8x16x4xf32, #tpu.memory_space<vmem>>, vector<1x8x16x4xf32>,
    return
  }
  func.func @transform_0(%arg0: i32, %arg1: i32) -> (i32, i32, i32, i32) {
    %c0_i32 = arith.constant 0 : i32
    %c0_i32_0 = arith.constant 0 : i32
    %c0_i32_1 = arith.constant 0 : i32
    return %arg0, %arg1, %c0_i32, %c0_i32_0 : i32, i32, i32, i32
  }
  func.func @transform_1(%arg0: i32, %arg1: i32) -> (i32, i32, i32, i32) {
    %c8_i32 = arith.constant 8 : i32
    %0 = arith.muli %arg1, %c8_i32 : i32
    %c1_i32 = arith.constant 1 : i32
    %1 = arith.subi %0, %c1_i32 : i32
    %c0_i32 = arith.constant 0 : i32
    %2 = arith.maxsi %1, %c0_i32 : i32
    %c0_i32_0 = arith.constant 0 : i32
    %c0_i32_1 = arith.constant 0 : i32
    %c0_i32_2 = arith.constant 0 : i32
    return %arg0, %2, %c0_i32_0, %c0_i32_1 : i32, i32, i32, i32
  }
  func.func @transform_2(%arg0: i32, %arg1: i32) -> (i32, i32, i32, i32) {
    %c1_i32 = arith.constant 1 : i32
    %0 = arith.addi %arg1, %c1_i32 : i32
    %c8_i32 = arith.constant 8 : i32
    %1 = arith.muli %0, %c8_i32 : i32
    %c15_i32 = arith.constant 15 : i32
    %2 = arith.minsi %1, %c15_i32 : i32
    %c0_i32 = arith.constant 0 : i32
    %c0_i32_0 = arith.constant 0 : i32
    %c0_i32_1 = arith.constant 0 : i32
    return %arg0, %2, %c0_i32, %c0_i32_0 : i32, i32, i32, i32
  }
  func.func @transform_3(%arg0: i32, %arg1: i32) -> (i32, i32, i32) {
    %c0_i32 = arith.constant 0 : i32
    %c0_i32_0 = arith.constant 0 : i32
    %c0_i32_1 = arith.constant 0 : i32
    %c0_i32_2 = arith.constant 0 : i32
    return %c0_i32, %c0_i32_0, %c0_i32_1 : i32, i32, i32
  }
  func.func @transform_4(%arg0: i32, %arg1: i32) -> (i32, i32, i32, i32) {
    %c0_i32 = arith.constant 0 : i32
    %c0_i32_0 = arith.constant 0 : i32
    %c0_i32_1 = arith.constant 0 : i32
    return %arg0, %arg1, %c0_i32, %c0_i32_0 : i32, i32, i32, i32
  }
}

</mosaic_0001>

<bundles_post_ra>
// kernel: tpu_custom_call.1
= control target key start
LH: loop header
LB: loop body
LE: loop exit
PB: predicated region body
PF: predicated region fallthrough
CT: control target
= control target key end

     0   :  { %s1511_s15 = smov 0   ;;  %s1513_s16 = smov 0   ;;  %s2256_s0 = inlined_call_operand.vmem [shape: f32[2,16,16,4], index: 0, kind: input, shape index: {}]   ;;  %s2257_s1 = inlined_call_operand.vmem [shape: f32[2,16,16,4], index: 1, kind: input, shape index: {}]   ;;  %s2258_s2 = inlined_call_operand.vmem [shape: f32[2,16,16,4], index: 2, kind: input, shape index: {}]   ;;  %s2259_s3 = inlined_call_operand.vmem [shape: f32[12,1,4], index: 3, kind: input, shape index: {}]   ;;  %s2260_s4 = inlined_call_operand.vmem [shape: f32[2,16,16,4], index: 4, kind: output, shape index: {}]  }
   0x1   :  { %s1515_s17 = smov 0   ;;  %s1517_s18 = smov 0  }
   0x2   :  { %s1519_s19 = smov 0  }
   0x3 LB: > { %s23_s20 = sadd.s32 1, %s1475_s17  ;;  %s26_s21 = sadd.s32 1, %s1479_s18  ;;  %s1483_s19 = sphi %s1519_s19, %s14_s19   ;;  %s1479_s18 = sphi %s1517_s18, %s2265_s18   ;;  %s1475_s17 = sphi %s1515_s17, %s2264_s17   ;;  %s1471_s16 = sphi %s1513_s16, %s2263_s16   ;;  %s1467_s15 = sphi %s1511_s15, %s2262_s15  }
   0x4   : > { %p24_p0 = scmp.ge.s32.totalorder %s23_s20, 2  ;;  %p1297_p1 = scmp.ge.s32.totalorder %s1483_s19, 1 }
   0x5   : > { %p248_p2 = scmp.lt.s32.totalorder %s1483_s19, 5 }
   0x6   : > { %s2267_s20 = smov (%p24_p0, %s23_s20), 0  ;;  %s2269_s21 = smov (!%p24_p0, %s26_s21), %s1479_s18 }
   0x7   : > { %p249_p3 = pnand %p1297_p1, %p248_p2  ;;  %p28_p4 = scmp.ge.s32.totalorder %s2269_s21, 2 }
   0x8   : > { %s1546_s22 = sshll.u32 (!%p249_p3), %s1467_s15, 3  ;;  %p311_p5 = scmp.lt.s32.totalorder (!%p249_p3), %s1471_s16, 1 }
   0x9   : > { %s2271_s21 = smov (%p28_p4, %s2269_s21), 0  ;;  %252 = sbr.rel (%p249_p3) target bundleno = 180 (0xb4), region = 36 }
   0xa   : > { %p313_p6 = scmp.lt.s32.totalorder (!%p249_p3), %s1546_s22, 15  ;;  %s1303_s23 = sadd.s32 (!%p249_p3), 4294967295, %s1546_s22 }
   0xb   : > { %p323_p7 = scmp.gt.s32.totalorder (!%p249_p3), %s1303_s23, 0  ;;  %p421_p8 = scmp.eq.s32.totalorder (!%p249_p3), %s1467_s15, 0 }
   0xc   : > { %p1304_p9 = scmp.lt.s32.totalorder (!%p249_p3), %s1303_s23, 15  ;;  %s1355_s7 = sadd.s32 (!%p249_p3), 8, %s1546_s22 }
   0xd   : > { %p1651_p10 = scmp.lt.s32.totalorder (!%p249_p3), %s1355_s7, 15  ;;  %p431_p11 = scmp.eq.s32.totalorder (!%p249_p3), %s1467_s15, 1 }
   0xe   : > { %vm366_vm0 = vcmask 24576   ;;  %v1485_v0 = vmov 0.0   ;;  %s2273_s16 = smov (!%p311_p5, %s1471_s16), 1  ;;  %vm404_vm1 = vcmask 31744   ;;  %v1621_v16 = vld [vmem:[%s2259_s3] ss:$0 sm:$0xff] }
   0xf   : > { %368 = vst.msk [vmem:[#allocation2 + $0x27] sm:$0x1] %vm366_vm0, %v1485_v0  ;;  %367 = vst.msk [vmem:[#allocation2 + $0x7] sm:$0x1] %vm366_vm0, %v1485_v0  ;;  %s314_s24 = scalar_select %p313_p6, %s1546_s22, 15 }
  0x10   : > { %369 = vst.msk [vmem:[#allocation2 + $0x47] sm:$0x1] %vm366_vm0, %v1485_v0  ;;  %370 = vst.msk [vmem:[#allocation2 + $0x67] sm:$0x1] %vm366_vm0, %v1485_v0  ;;  %s1575_s25 = sshll.u32 %s2273_s16, 5  ;;  %s2277_s7 = smov (!%p1651_p10, %s1355_s7), 15 }
  0x11   : > { %371 = vst.msk [vmem:[#allocation2 + $0x87] sm:$0x1] %vm366_vm0, %v1485_v0  ;;  %372 = vst.msk [vmem:[#allocation2 + $0xa7] sm:$0x1] %vm366_vm0, %v1485_v0  ;;  %s1299_s26 = sshll.u32 %s314_s24, 1  ;;  %s2279_s7 = smov (!%p1651_p10, %s2277_s7), 15 }
  0x12   : > { %373 = vst.msk [vmem:[#allocation2 + $0xc7] sm:$0x1] %vm366_vm0, %v1485_v0  ;;  %374 = vst.msk [vmem:[#allocation2 + $0xe7] sm:$0x1] %vm366_vm0, %v1485_v0  ;;  %s1578_s27 = sadd.s32 %s1575_s25, %s1299_s26  ;;  %v1626_v17 = vld [vmem:[%s2259_s3 + $0x1] ss:$0 sm:$0xff] }
  0x13   : > { %375 = vst.msk [vmem:[#allocation2 + $0x107] sm:$0x1] %vm366_vm0, %v1485_v0  ;;  %376 = vst.msk [vmem:[#allocation2 + $0x127] sm:$0x1] %vm366_vm0, %v1485_v0  ;;  %s1301_s28 = sshll.u32 %s1578_s27, 3  ;;  %s1316_s22 = sshll.u32 %s2279_s7, 1 }
  0x14   : > { %377 = vst.msk [vmem:[#allocation2 + $0x18] sm:$0x1] %vm366_vm0, %v1485_v0  ;;  %378 = vst.msk [vmem:[#allocation2 + $0x38] sm:$0x1] %vm366_vm0, %v1485_v0  ;;  %s1587_s5 = scalar_lea.vmem %s2256_s0, %s1301_s28  ;;  %v1631_v18 = vld [vmem:[%s2259_s3 + $0x2] ss:$0 sm:$0xff]  ;;  %s348_s29 = sadd.s32 %s1316_s22, %s1575_s25 }
  0x15   : > { %379 = vst.msk [vmem:[#allocation2 + $0x58] sm:$0x1] %vm366_vm0, %v1485_v0  ;;  %380 = vst.msk [vmem:[#allocation2 + $0x78] sm:$0x1] %vm366_vm0, %v1485_v0  ;;  %v387_v1 = vld [vmem:[%s1587_s5] sm:$0xff]  ;;  %v388_v2 = vld [vmem:[%s1587_s5 + $0x8] sm:$0xff] }
  0x16   : > { %381 = vst.msk [vmem:[#allocation2 + $0x98] sm:$0x1] %vm366_vm0, %v1485_v0  ;;  %382 = vst.msk [vmem:[#allocation2 + $0xb8] sm:$0x1] %vm366_vm0, %v1485_v0  ;;  %v389_v3 = vld [vmem:[%s1587_s5 + $0x10] sm:$0xff]  ;;  %s324_s6 = scalar_select %p323_p7, %s1303_s23, 0 }
  0x17   : > { %383 = vst.msk [vmem:[#allocation2 + $0xd8] sm:$0x1] %vm366_vm0, %v1485_v0  ;;  %384 = vst.msk [vmem:[#allocation2 + $0xf8] sm:$0x1] %vm366_vm0, %v1485_v0  ;;  %v390_v4 = vld [vmem:[%s1587_s5 + $0x18] sm:$0xff]  ;;  %v391_v5 = vld [vmem:[%s1587_s5 + $0x20] sm:$0xff] }
  0x18   : > { %385 = vst.msk [vmem:[#allocation2 + $0x118] sm:$0x1] %vm366_vm0, %v1485_v0  ;;  %386 = vst.msk [vmem:[#allocation2 + $0x138] sm:$0x1] %vm366_vm0, %v1485_v0  ;;  %v392_v6 = vld [vmem:[%s1587_s5 + $0x28] sm:$0xff]  ;;  %v393_v7 = vld [vmem:[%s1587_s5 + $0x30] sm:$0xff] }
  0x19   : > { %405 = vst.msk [vmem:[#allocation2 + $0x28] sm:$0xff] %vm404_vm1, %v387_v1  ;;  %406 = vst.msk [vmem:[#allocation2 + $0x30] sm:$0xff] %vm404_vm1, %v388_v2  ;;  %v394_v8 = vld [vmem:[%s1587_s5 + $0x38] sm:$0xff]  ;;  %v395_v9 = vld [vmem:[%s1587_s5 + $0x40] sm:$0xff]  ;;  %s2275_s6 = smov (!%p1304_p9, %s324_s6), 15  ;;  %s1318_s7 = sshll.u32 %s348_s29, 3 }
  0x1a   : > { %407 = vst.msk [vmem:[#allocation2 + $0x48] sm:$0xff] %vm404_vm1, %v389_v3  ;;  %408 = vst.msk [vmem:[#allocation2 + $0x50] sm:$0xff] %vm404_vm1, %v390_v4  ;;  %v396_v10 = vld [vmem:[%s1587_s5 + $0x48] sm:$0xff]  ;;  %v397_v11 = vld [vmem:[%s1587_s5 + $0x50] sm:$0xff]  ;;  %s1309_s8 = sshll.u32 %s2275_s6, 1  ;;  %s350_s6 = scalar_lea.vmem %s2258_s2, %s1318_s7 }
  0x1b   : > { %409 = vst.msk [vmem:[#allocation2 + $0x68] sm:$0xff] %vm404_vm1, %v391_v5  ;;  %410 = vst.msk [vmem:[#allocation2 + $0x70] sm:$0xff] %vm404_vm1, %v392_v6  ;;  %v398_v12 = vld [vmem:[%s1587_s5 + $0x58] sm:$0xff]  ;;  %v399_v13 = vld [vmem:[%s1587_s5 + $0x60] sm:$0xff]  ;;  %s331_s16 = sadd.s32 %s1309_s8, %s1575_s25 }
  0x1c   : > { %411 = vst.msk [vmem:[#allocation2 + $0x88] sm:$0xff] %vm404_vm1, %v393_v7  ;;  %412 = vst.msk [vmem:[#allocation2 + $0x90] sm:$0xff] %vm404_vm1, %v394_v8  ;;  %v400_v14 = vld [vmem:[%s1587_s5 + $0x68] sm:$0xff]  ;;  %v401_v15 = vld [vmem:[%s1587_s5 + $0x70] sm:$0xff]  ;;  %s1311_s30 = sshll.u32 %s331_s16, 3  ;;  %s1988_s16 = scalar_lea.vmem %s2260_s4, %s1301_s28 }
  0x1d   : > { %413 = vst.msk [vmem:[#allocation2 + $0xa8] sm:$0xff] %vm404_vm1, %v395_v9  ;;  %414 = vst.msk [vmem:[#allocation2 + $0xb0] sm:$0xff] %vm404_vm1, %v396_v10  ;;  %v402_v19 = vld [vmem:[%s1587_s5 + $0x78] sm:$0xff]  ;;  %v1641_v20 = vld [vmem:[%s2259_s3 + $0x3] ss:$0 sm:$0xff]  ;;  %s333_s13 = scalar_lea.vmem %s2257_s1, %s1311_s30 }
  0x1e   : > { %415 = vst.msk [vmem:[#allocation2 + $0xc8] sm:$0xff] %vm404_vm1, %v397_v11  ;;  %416 = vst.msk [vmem:[#allocation2 + $0xd0] sm:$0xff] %vm404_vm1, %v398_v12  ;;  %v1646_v21 = vld [vmem:[%s2259_s3 + $0x4] ss:$0 sm:$0xff]  ;;  %v1658_v22 = vld [vmem:[%s2259_s3 + $0x5] ss:$0 sm:$0xff] }
  0x1f   : > { %417 = vst.msk [vmem:[#allocation2 + $0xe8] sm:$0xff] %vm404_vm1, %v399_v13  ;;  %418 = vst.msk [vmem:[#allocation2 + $0xf0] sm:$0xff] %vm404_vm1, %v400_v14  ;;  %v1663_v23 = vld [vmem:[%s2259_s3 + $0x6] ss:$0 sm:$0xff]  ;;  %v1672_v24 = vld [vmem:[%s2259_s3 + $0x7] ss:$0 sm:$0xff] }
  0x20   : > { %419 = vst.msk [vmem:[#allocation2 + $0x108] sm:$0xff] %vm404_vm1, %v401_v15  ;;  %420 = vst.msk [vmem:[#allocation2 + $0x110] sm:$0xff] %vm404_vm1, %v402_v19  ;;  %v1677_v25 = vld [vmem:[%s2259_s3 + $0x8] ss:$0 sm:$0xff]  ;;  %s1398_s26 = scalar_select %p421_p8, 0, 255 }
  0x21   : > { %v450_v26 = vld [vmem:[#allocation2 + $0x27] sm:$0xff]  ;;  %v451_v47 = vld [vmem:[#allocation2 + $0x2f] sm:$0xff]  ;;  %s1404_s5 = scalar_select %p431_p11, 0, 255 }
  0x22   : > { %v489_v27 = vld [vmem:[#allocation2 + $0x28] sm:$0xff]  ;;  %v473_v29 = vmul.f32 %v1621_v16, %v450_v26  ;;  %v1399_v35 = vld [vmem:[%s333_s13] sm:%s1398_s26]  ;;  %v474_v50 = vmul.f32 %v1621_v16, %v451_v47  ;;  %v490_v51 = vld [vmem:[#allocation2 + $0x30] sm:$0xff] }
  0x23   : > { %v545_v28 = vld [vmem:[#allocation2 + $0x29] sm:$0xff]  ;;  %v513_v30 = vmul.f32 %v1626_v17, %v489_v27  ;;  %429 = vst.msk [vmem:[#allocation2 + $0x8] sm:$0xff] %vm404_vm1, %v1399_v35  ;;  %v546_v52 = vld [vmem:[#allocation2 + $0x31] sm:$0xff]  ;;  %v514_v56 = vmul.f32 %v1626_v17, %v490_v51 }
  0x24   : > { %v569_v31 = vmul.f32 %v1631_v18, %v545_v28  ;;  %v601_v32 = vld [vmem:[#allocation2 + $0x47] sm:$0xff]  ;;  %v570_v57 = vmul.f32 %v1631_v18, %v546_v52  ;;  %v602_v58 = vld [vmem:[#allocation2 + $0x4f] sm:$0xff] }
  0x25   : > { %v1684_v33 = vld [vmem:[#allocation2 + $0x48] sm:$0xff]  ;;  %v625_v36 = vmul.f32 %v1641_v20, %v601_v32  ;;  %v475_v41 = vmul.f32 %v1621_v16, %v601_v32  ;;  %v529_v43 = vadd.f32 %v513_v30, %v473_v29  ;;  %v1728_v59 = vld [vmem:[#allocation2 + $0x50] sm:$0xff]  ;;  %v626_v61 = vmul.f32 %v1641_v20, %v602_v58 }
  0x26   : > { %v713_v34 = vld [vmem:[#allocation2 + $0x49] sm:$0xff]  ;;  %v681_v37 = vmul.f32 %v1646_v21, %v1684_v33  ;;  %v515_v48 = vmul.f32 %v1626_v17, %v1684_v33  ;;  %v714_v60 = vld [vmem:[#allocation2 + $0x51] sm:$0xff]  ;;  %v682_v62 = vmul.f32 %v1646_v21, %v1728_v59  ;;  %v530_v4 = vadd.f32 %v514_v56, %v474_v50 }
  0x27   : > { %v737_v38 = vmul.f32 %v1658_v22, %v713_v34  ;;  %v1696_v39 = vld [vmem:[#allocation2 + $0x67] sm:$0xff]  ;;  %v571_v53 = vmul.f32 %v1631_v18, %v713_v34  ;;  %v585_v55 = vadd.f32 %v569_v31, %v529_v43  ;;  %v738_v63 = vmul.f32 %v1658_v22, %v714_v60  ;;  %v1734_v0 = vld [vmem:[#allocation2 + $0x6f] sm:$0xff] }
  0x28   : > { %v1698_v40 = vld [vmem:[#allocation2 + $0x68] sm:$0xff]  ;;  %v1704_v44 = vmul.f32 %v1663_v23, %v1696_v39  ;;  %v627_v54 = vmul.f32 %v1641_v20, %v1696_v39  ;;  %v1736_v1 = vld [vmem:[#allocation2 + $0x70] sm:$0xff]  ;;  %v795_v5 = vmul.f32 %v1663_v23, %v1734_v0  ;;  %v531_v9 = vadd.f32 %v515_v48, %v475_v41 }
  0x29   : > { %v1402_v42 = vld [vmem:[%s333_s13 + $0x8] sm:%s1398_s26]  ;;  %v1708_v45 = vmul.f32 %v1672_v24, %v1698_v40  ;;  %v1738_v2 = vld [vmem:[#allocation2 + $0x71] sm:$0xff]  ;;  %v641_v3 = vadd.f32 %v625_v36, %v585_v55  ;;  %v1745_v6 = vmul.f32 %v1672_v24, %v1736_v1  ;;  %v683_v10 = vmul.f32 %v1646_v21, %v1698_v40 }
  0x2a   : > { %v1710_v46 = vld [vmem:[#allocation2 + $0x69] sm:$0xff]  ;;  %430 = vst.msk [vmem:[#allocation2 + $0x10] sm:$0xff] %vm404_vm1, %v1402_v42  ;;  %v1751_v8 = vmul.f32 %v1677_v25, %v1738_v2  ;;  %v586_v15 = vadd.f32 %v570_v57, %v530_v4  ;;  %v587_v27 = vadd.f32 %v571_v53, %v531_v9  ;;  %v476_v29 = vmul.f32 %v1621_v16, %v602_v58  ;;  %v1778_v36 = vld [vmem:[#allocation2 + $0x91] sm:$0xff] }
  0x2b   : > { %v1720_v49 = vmul.f32 %v1677_v25, %v1710_v46  ;;  %v1747_v7 = vld [vmem:[#allocation2 + $0x89] sm:$0xff]  ;;  %v739_v11 = vmul.f32 %v1658_v22, %v1710_v46  ;;  %v697_v14 = vadd.f32 %v681_v37, %v641_v3  ;;  %v516_v30 = vmul.f32 %v1626_v17, %v1728_v59  ;;  %v1405_v37 = vld [vmem:[%s350_s6] sm:%s1404_s5] }
  0x2c   : > { %v1757_v12 = vld [vmem:[#allocation2 + $0x87] sm:$0xff]  ;;  %v908_v28 = vmul.f32 %v1677_v25, %v1747_v7  ;;  %v642_v32 = vadd.f32 %v626_v61, %v586_v15  ;;  %v572_v34 = vmul.f32 %v1631_v18, %v714_v60  ;;  %v628_v35 = vmul.f32 %v1641_v20, %v1734_v0  ;;  %v1784_v48 = vld [vmem:[#allocation2 + $0x8f] sm:$0xff]  ;;  %440 = vst.msk [vmem:[#allocation2 + $0x128] sm:$0xff] %vm404_vm1, %v1405_v37 }
  0x2d   : > { %v1759_v13 = vld [vmem:[#allocation2 + $0x88] sm:$0xff]  ;;  %v796_v19 = vmul.f32 %v1663_v23, %v1757_v12  ;;  %v753_v31 = vadd.f32 %v737_v38, %v697_v14  ;;  %v643_v41 = vadd.f32 %v627_v54, %v587_v27  ;;  %v532_v42 = vadd.f32 %v516_v30, %v476_v29  ;;  %v1786_v38 = vld [vmem:[#allocation2 + $0x90] sm:$0xff] }
  0x2e   : > { %v852_v26 = vmul.f32 %v1672_v24, %v1759_v13  ;;  %v684_v43 = vmul.f32 %v1646_v21, %v1736_v1  ;;  %v740_v47 = vmul.f32 %v1658_v22, %v1738_v2  ;;  %v1408_v50 = vld [vmem:[%s350_s6 + $0x8] sm:%s1404_s5]  ;;  %v698_v52 = vadd.f32 %v682_v62, %v642_v32 }
  0x2f   : > { %v810_v51 = vadd.f32 %v1704_v44, %v753_v31  ;;  %v797_v53 = vmul.f32 %v1663_v23, %v1784_v48  ;;  %v853_v54 = vmul.f32 %v1672_v24, %v1786_v38  ;;  %441 = vst.msk [vmem:[#allocation2 + $0x130] sm:$0xff] %vm404_vm1, %v1408_v50  ;;  %v699_v55 = vadd.f32 %v683_v10, %v643_v41  ;;  %v1807_v3 = vld [vmem:[%s2259_s3 + $0x9] ss:$0 sm:$0xff] }
  0x30   : > { %v588_v56 = vadd.f32 %v572_v34, %v532_v42  ;;  %v909_v57 = vmul.f32 %v1677_v25, %v1778_v36  ;;  %v477_v58 = vmul.f32 %v1621_v16, %v1696_v39  ;;  %v754_v44 = vadd.f32 %v738_v63, %v698_v52  ;;  %v1818_v27 = vld [vmem:[#allocation2 + $0xa7] sm:$0xff] }
  0x31   : > { %v866_v60 = vadd.f32 %v1708_v45, %v810_v51  ;;  %v517_v61 = vmul.f32 %v1626_v17, %v1698_v40  ;;  %v573_v62 = vmul.f32 %v1631_v18, %v1710_v46  ;;  %v755_v4 = vadd.f32 %v739_v11, %v699_v55  ;;  %v1813_v45 = vld [vmem:[#allocation2 + $0xa9] sm:$0xff] }
  0x32   : > { %v644_v9 = vadd.f32 %v628_v35, %v588_v56  ;;  %v629_v10 = vmul.f32 %v1641_v20, %v1757_v12  ;;  %v685_v39 = vmul.f32 %v1646_v21, %v1759_v13  ;;  %v811_v14 = vadd.f32 %v795_v5, %v754_v44  ;;  %v1820_v29 = vld [vmem:[#allocation2 + $0xa8] sm:$0xff] }
  0x33   : > { %v922_v63 = vadd.f32 %v1720_v49, %v866_v60  ;;  %v533_v15 = vadd.f32 %v517_v61, %v477_v58  ;;  %v741_v46 = vmul.f32 %v1658_v22, %v1747_v7  ;;  %v812_v11 = vadd.f32 %v796_v19, %v755_v4 }
  0x34   : > { %v700_v30 = vadd.f32 %v684_v43, %v644_v9  ;;  %v798_v31 = vmul.f32 %v1663_v23, %v1818_v27  ;;  %v854_v32 = vmul.f32 %v1672_v24, %v1820_v29  ;;  %v867_v49 = vadd.f32 %v1745_v6, %v811_v14 }
  0x35   : > { %v1827_v34 = vadd.f32 %v1807_v3, %v922_v63  ;;  %v589_v5 = vadd.f32 %v573_v62, %v533_v15  ;;  %v910_v35 = vmul.f32 %v1677_v25, %v1813_v45  ;;  %v868_v37 = vadd.f32 %v852_v26, %v812_v11 }
  0x36   : > { %v756_v41 = vadd.f32 %v740_v47, %v700_v30  ;;  %v478_v19 = vmul.f32 %v1621_v16, %v1734_v0  ;;  %v518_v42 = vmul.f32 %v1626_v17, %v1736_v1  ;;  %v923_v50 = vadd.f32 %v1751_v8, %v867_v49 }
  0x37   : > { %v960_v43 = vmul.f32 %v1827_v34, %v1827_v34  ;;  %v645_v51 = vadd.f32 %v629_v10, %v589_v5  ;;  %v574_v6 = vmul.f32 %v1631_v18, %v1738_v2  ;;  %v924_v52 = vadd.f32 %v908_v28, %v868_v37  ;;  %v1853_v28 = vld [vmem:[#allocation2 + $0xaf] sm:$0xff] }
  0x38   : > { %v813_v55 = vadd.f32 %v797_v53, %v756_v41  ;;  %v534_v56 = vadd.f32 %v518_v42, %v478_v19  ;;  %v630_v26 = vmul.f32 %v1641_v20, %v1784_v48  ;;  %v1844_v0 = vadd.f32 %v1807_v3, %v923_v50  ;;  %v1855_v53 = vld [vmem:[#allocation2 + $0xb1] sm:$0xff] }
  0x39   : > { %v976_v47 = vmul.f32 0.035677407, %v960_v43  ;;  %v701_v58 = vadd.f32 %v685_v39, %v645_v51  ;;  %v686_v60 = vmul.f32 %v1646_v21, %v1786_v38  ;;  %v1849_v8 = vadd.f32 %v1807_v3, %v924_v52  ;;  %v1861_v39 = vld [vmem:[#allocation2 + $0xb0] sm:$0xff] }
  0x3a   : > { %v869_v44 = vadd.f32 %v853_v54, %v813_v55  ;;  %v590_v61 = vadd.f32 %v574_v6, %v534_v56  ;;  %v742_v2 = vmul.f32 %v1658_v22, %v1778_v36  ;;  %v961_v4 = vmul.f32 %v1844_v0, %v1844_v0 }
  0x3b   : > { %v992_v62 = vadd.f32 0.7978846, %v976_v47  ;;  %v757_v9 = vadd.f32 %v741_v46, %v701_v58  ;;  %v799_v10 = vmul.f32 %v1663_v23, %v1853_v28  ;;  %v962_v54 = vmul.f32 %v1849_v8, %v1849_v8 }
  0x3c   : > { %v925_v63 = vadd.f32 %v909_v57, %v869_v44  ;;  %v646_v14 = vadd.f32 %v630_v26, %v590_v61  ;;  %v855_v15 = vmul.f32 %v1672_v24, %v1861_v39  ;;  %v977_v30 = vmul.f32 0.035677407, %v961_v4  ;;  %v1894_v61 = vld [vmem:[#allocation2 + $0xc7] sm:$0xff] }
  0x3d   : > { %v1008_v11 = vmul.f32 %v992_v62, %v1827_v34  ;;  %v814_v49 = vadd.f32 %v798_v31, %v757_v9  ;;  %v911_v46 = vmul.f32 %v1677_v25, %v1855_v53  ;;  %v978_v5 = vmul.f32 0.035677407, %v962_v54  ;;  %v1898_v9 = vld [vmem:[#allocation2 + $0xc8] sm:$0xff] }
  0x3e   : > { %v1871_v37 = vadd.f32 %v1807_v3, %v925_v63  ;;  %v702_v41 = vadd.f32 %v686_v60, %v646_v14  ;;  %v479_v19 = vmul.f32 %v1621_v16, %v1757_v12  ;;  %v993_v57 = vadd.f32 0.7978846, %v977_v30  ;;  %v1887_v60 = vld [vmem:[#allocation2 + $0xc9] sm:$0xff] }
  0x3f   : > { %1409 = vtanh.f32 %v1008_v11  ;;  %v870_v42 = vadd.f32 %v854_v32, %v814_v49  ;;  %v519_v43 = vmul.f32 %v1626_v17, %v1759_v13  ;;  %v994_v50 = vadd.f32 0.7978846, %v978_v5 }
  0x40   : > { %v963_v31 = vmul.f32 %v1871_v37, %v1871_v37  ;;  %v758_v51 = vadd.f32 %v742_v2, %v702_v41  ;;  %v575_v6 = vmul.f32 %v1631_v18, %v1747_v7  ;;  %v1009_v52 = vmul.f32 %v993_v57, %v1844_v0 }
  0x41   : > { %v926_v55 = vadd.f32 %v910_v35, %v870_v42  ;;  %v535_v56 = vadd.f32 %v519_v43, %v479_v19  ;;  %v631_v12 = vmul.f32 %v1641_v20, %v1818_v27  ;;  %v1010_v32 = vmul.f32 %v994_v50, %v1849_v8  ;;  %v1915_v42 = vld [vmem:[#allocation2 + $0xd1] sm:$0xff] }
  0x42   : > { %v979_v26 = vmul.f32 0.035677407, %v963_v31  ;;  %v815_v47 = vadd.f32 %v799_v10, %v758_v51  ;;  %v687_v58 = vmul.f32 %v1646_v21, %v1820_v29  ;;  %1411 = vtanh.f32 %v1009_v52  ;;  %v1922_v50 = vld [vmem:[#allocation2 + $0xcf] sm:$0xff] }
  0x43   : > { %v1890_v44 = vadd.f32 %v1807_v3, %v926_v55  ;;  %v591_v7 = vadd.f32 %v575_v6, %v535_v56  ;;  %v743_v35 = vmul.f32 %v1658_v22, %v1813_v45  ;;  %1413 = vtanh.f32 %v1010_v32  ;;  %v1928_v52 = vld [vmem:[#allocation2 + $0xd0] sm:$0xff] }
  0x44   : > { %v995_v2 = vadd.f32 0.7978846, %v979_v26  ;;  %v871_v62 = vadd.f32 %v855_v15, %v815_v47  ;;  %v800_v4 = vmul.f32 %v1663_v23, %v1894_v61  ;;  %v856_v63 = vmul.f32 %v1672_v24, %v1898_v9 }
  0x45   : > { %v964_v10 = vmul.f32 %v1890_v44, %v1890_v44  ;;  %v647_v54 = vadd.f32 %v631_v12, %v591_v7  ;;  %v912_v14 = vmul.f32 %v1677_v25, %v1887_v60  ;;  %v480_v15 = vmul.f32 %v1621_v16, %v1784_v48 }
  0x46   : > { %v1011_v11 = vmul.f32 %v995_v2, %v1871_v37  ;;  %v927_v30 = vadd.f32 %v911_v46, %v871_v62  ;;  %v520_v49 = vmul.f32 %v1626_v17, %v1786_v38  ;;  %v576_v19 = vmul.f32 %v1631_v18, %v1778_v36 }
  0x47   : > { %v980_v5 = vmul.f32 0.035677407, %v964_v10  ;;  %v703_v41 = vadd.f32 %v687_v58, %v647_v54  ;;  %v632_v57 = vmul.f32 %v1641_v20, %v1853_v28  ;;  %v688_v48 = vmul.f32 %v1646_v21, %v1861_v39 }
  0x48   : > { %1415 = vtanh.f32 %v1011_v11  ;;  %v1918_v43 = vadd.f32 %v1807_v3, %v927_v30  ;;  %v536_v46 = vadd.f32 %v520_v49, %v480_v15  ;;  %v744_v36 = vmul.f32 %v1658_v22, %v1855_v53 }
  0x49   : > { %v996_v31 = vadd.f32 0.7978846, %v980_v5  ;;  %v759_v51 = vadd.f32 %v743_v35, %v703_v41  ;;  %v801_v6 = vmul.f32 %v1663_v23, %v1922_v50  ;;  %v857_v12 = vmul.f32 %v1672_v24, %v1928_v52 }
  0x4a   : > { %v965_v55 = vmul.f32 %v1918_v43, %v1918_v43  ;;  %v592_v56 = vadd.f32 %v576_v19, %v536_v46  ;;  %v913_v32 = vmul.f32 %v1677_v25, %v1915_v42  ;;  %v481_v58 = vmul.f32 %v1621_v16, %v1818_v27  ;;  %v1950_v27 = vld [vmem:[%s2259_s3 + $0xa] ss:$0 sm:$0xff] }
  0x4b   : > { %v1012_v26 = vmul.f32 %v996_v31, %v1890_v44  ;;  %v816_v47 = vadd.f32 %v800_v4, %v759_v51  ;;  %v521_v7 = vmul.f32 %v1626_v17, %v1820_v29  ;;  %v577_v10 = vmul.f32 %v1631_v18, %v1813_v45  ;;  %v1945_v4 = vld [vmem:[#allocation2 + $0xe9] sm:$0xff] }
  0x4c   : > { %v1410_v35 = vpop.eup %1409  ;;  %v981_v2 = vmul.f32 0.035677407, %v965_v55  ;;  %v648_v62 = vadd.f32 %v632_v57, %v592_v56  ;;  %v633_v54 = vmul.f32 %v1641_v20, %v1894_v61  ;;  %v689_v41 = vmul.f32 %v1646_v21, %v1898_v9  ;;  %v1956_v19 = vld [vmem:[#allocation2 + $0xe7] sm:$0xff] }
  0x4d   : > { %v1040_v11 = vadd.f32 1.0, %v1410_v35  ;;  %1417 = vtanh.f32 %v1012_v26  ;;  %v872_v30 = vadd.f32 %v856_v63, %v816_v47  ;;  %v537_v15 = vadd.f32 %v521_v7, %v481_v58  ;;  %v1961_v51 = vld [vmem:[#allocation2 + $0xe8] sm:$0xff] }
  0x4e   : > { %v997_v49 = vadd.f32 0.7978846, %v981_v2  ;;  %v704_v5 = vadd.f32 %v688_v48, %v648_v62  ;;  %v745_v45 = vmul.f32 %v1658_v22, %v1887_v60  ;;  %v802_v31 = vmul.f32 %v1663_v23, %v1956_v19  ;;  %v1966_v48 = vld [vmem:[%s2259_s3 + $0xb] ss:$0 sm:$0xff] }
  0x4f   : > { %v1056_v63 = vmul.f32 %v1040_v11, %v1827_v34  ;;  %v928_v57 = vadd.f32 %v912_v14, %v872_v30  ;;  %v593_v46 = vadd.f32 %v577_v10, %v537_v15  ;;  %v1412_v55 = vpop.eup %1411  ;;  %v858_v34 = vmul.f32 %v1672_v24, %v1961_v51 }
  0x50   : > { %v1013_v56 = vmul.f32 %v997_v49, %v1918_v43  ;;  %v760_v26 = vadd.f32 %v744_v36, %v704_v5  ;;  %v914_v14 = vmul.f32 %v1677_v25, %v1945_v4  ;;  %v1414_v47 = vpop.eup %1413  ;;  %v1041_v7 = vadd.f32 1.0, %v1412_v55 }
  0x51   : > { %v1078_v58 = vmul.f32 %v1950_v27, %v1056_v63  ;;  %v1975_v35 = vadd.f32 %v1807_v3, %v928_v57  ;;  %v649_v2 = vadd.f32 %v633_v54, %v593_v46  ;;  %v1042_v62 = vadd.f32 1.0, %v1414_v47 }
  0x52   : > { %1419 = vtanh.f32 %v1013_v56  ;;  %v817_v10 = vadd.f32 %v801_v6, %v760_v26  ;;  %v482_v36 = vmul.f32 %v1621_v16, %v1853_v28  ;;  %v1057_v30 = vmul.f32 %v1041_v7, %v1844_v0 }
  0x53   : > { %v1100_v11 = vadd.f32 %v1966_v48, %v1078_v58  ;;  %v966_v15 = vmul.f32 %v1975_v35, %v1975_v35  ;;  %v705_v49 = vadd.f32 %v689_v41, %v649_v2  ;;  %v1058_v6 = vmul.f32 %v1042_v62, %v1849_v8 }
  0x54   : > { %v873_v54 = vadd.f32 %v857_v12, %v817_v10  ;;  %v522_v28 = vmul.f32 %v1626_v17, %v1861_v39  ;;  %v578_v0 = vmul.f32 %v1631_v18, %v1855_v53  ;;  %v1079_v41 = vmul.f32 %v1950_v27, %v1057_v30 }
  0x55   : > { %v1416_v5 = vpop.eup %1415  ;;  %v1116_v63 = vadd.f32 %v1100_v11, %v1684_v33  ;;  %v982_v57 = vmul.f32 0.035677407, %v966_v15  ;;  %v761_v46 = vadd.f32 %v745_v45, %v705_v49  ;;  %v1080_v55 = vmul.f32 %v1950_v27, %v1058_v6 }
  0x56   : > { %v1043_v56 = vadd.f32 1.0, %v1416_v5  ;;  %v929_v26 = vadd.f32 %v913_v32, %v873_v54  ;;  %v538_v47 = vadd.f32 %v522_v28, %v482_v36  ;;  %v1101_v8 = vadd.f32 %v1966_v48, %v1079_v41  ;;  %v2023_v28 = vld [vmem:[#allocation2 + $0xef] sm:$0xff] }
  0x57   : > { %1132 = vst.msk [vmem:[%s1988_s16 + $0x10] sm:$0xff] %vm404_vm1, %v1116_v63  ;;  %v998_v12 = vadd.f32 0.7978846, %v982_v57  ;;  %v818_v58 = vadd.f32 %v802_v31, %v761_v46  ;;  %v634_v53 = vmul.f32 %v1641_v20, %v1922_v50  ;;  %v1102_v33 = vadd.f32 %v1966_v48, %v1080_v55 }
  0x58   : > { %v1059_v7 = vmul.f32 %v1043_v56, %v1871_v37  ;;  %v2006_v45 = vadd.f32 %v1807_v3, %v929_v26  ;;  %v594_v32 = vadd.f32 %v578_v0, %v538_v47  ;;  %v1117_v2 = vadd.f32 %v1101_v8, %v1728_v59  ;;  %v2039_v47 = vld [vmem:[#allocation2 + $0xf1] sm:$0xff] }
  0x59   : > { %v1014_v62 = vmul.f32 %v998_v12, %v1975_v35  ;;  %v874_v10 = vadd.f32 %v858_v34, %v818_v58  ;;  %v690_v31 = vmul.f32 %v1646_v21, %v1928_v52  ;;  %v1118_v11 = vadd.f32 %v1102_v33, %v1698_v40 }
  0x5a   : > { %v1418_v36 = vpop.eup %1417  ;;  %v1081_v30 = vmul.f32 %v1950_v27, %v1059_v7  ;;  %v967_v37 = vmul.f32 %v2006_v45, %v2006_v45  ;;  %v650_v15 = vadd.f32 %v634_v53, %v594_v32  ;;  %1133 = vst.msk [vmem:[%s1988_s16 + $0x18] sm:$0xff] %vm404_vm1, %v1117_v2  ;;  %v746_v40 = vmul.f32 %v1658_v22, %v1915_v42 }
  0x5b   : > { %v1044_v49 = vadd.f32 1.0, %v1418_v36  ;;  %1421 = vtanh.f32 %v1014_v62  ;;  %v930_v59 = vadd.f32 %v914_v14, %v874_v10  ;;  %1134 = vst.msk [vmem:[%s1988_s16 + $0x20] sm:$0xff] %vm404_vm1, %v1118_v11  ;;  %v803_v14 = vmul.f32 %v1663_v23, %v2023_v28 }
  0x5c   : > { %v1103_v34 = vadd.f32 %v1966_v48, %v1081_v30  ;;  %v983_v6 = vmul.f32 0.035677407, %v967_v37  ;;  %v706_v54 = vadd.f32 %v690_v31, %v650_v15  ;;  %v483_v46 = vmul.f32 %v1621_v16, %v1894_v61  ;;  %v780_v37 = vld [vmem:[#allocation2 + $0x107] sm:$0xff] }
  0x5d   : > { %v1060_v0 = vmul.f32 %v1044_v49, %v1890_v44  ;;  %v2027_v5 = vadd.f32 %v1807_v3, %v930_v59  ;;  %v2037_v44 = vld [vmem:[#allocation2 + $0xf0] sm:$0xff]  ;;  %v523_v8 = vmul.f32 %v1626_v17, %v1898_v9  ;;  %v635_v2 = vmul.f32 %v1641_v20, %v1956_v19  ;;  %v2059_v15 = vld [vmem:[#allocation2 + $0x108] sm:$0xff] }
  0x5e   : > { %v1119_v63 = vadd.f32 %v1103_v34, %v1736_v1  ;;  %v999_v41 = vadd.f32 0.7978846, %v983_v6  ;;  %v762_v57 = vadd.f32 %v746_v40, %v706_v54  ;;  %v579_v1 = vmul.f32 %v1631_v18, %v1887_v60  ;;  %v892_v54 = vld [vmem:[#allocation2 + $0x109] sm:$0xff] }
  0x5f   : > { %v1420_v55 = vpop.eup %1419  ;;  %v1082_v56 = vmul.f32 %v1950_v27, %v1060_v0  ;;  %v968_v26 = vmul.f32 %v2027_v5, %v2027_v5  ;;  %v859_v53 = vmul.f32 %v1672_v24, %v2037_v44  ;;  %v539_v32 = vadd.f32 %v523_v8, %v483_v46 }
  0x60   : > { %1135 = vst.msk [vmem:[%s1988_s16 + $0x28] sm:$0xff] %vm404_vm1, %v1119_v63  ;;  %v1045_v12 = vadd.f32 1.0, %v1420_v55  ;;  %v1015_v61 = vmul.f32 %v999_v41, %v2006_v45  ;;  %v819_v58 = vadd.f32 %v803_v14, %v762_v57  ;;  %v915_v10 = vmul.f32 %v1677_v25, %v2039_v47 }
  0x61   : > { %v1104_v33 = vadd.f32 %v1966_v48, %v1082_v56  ;;  %v984_v7 = vmul.f32 0.035677407, %v968_v26  ;;  %v595_v11 = vadd.f32 %v579_v1, %v539_v32  ;;  %v691_v30 = vmul.f32 %v1646_v21, %v1961_v51 }
  0x62   : > { %v1061_v62 = vmul.f32 %v1045_v12, %v1918_v43  ;;  %1423 = vtanh.f32 %v1015_v61  ;;  %v875_v60 = vadd.f32 %v859_v53, %v819_v58  ;;  %v747_v43 = vmul.f32 %v1658_v22, %v1945_v4 }
  0x63   : > { %v1120_v31 = vadd.f32 %v1104_v33, %v1759_v13  ;;  %v1000_v36 = vadd.f32 0.7978846, %v984_v7  ;;  %v804_v34 = vmul.f32 %v1663_v23, %v780_v37  ;;  %v651_v6 = vadd.f32 %v635_v2, %v595_v11  ;;  %v781_v33 = vld [vmem:[#allocation2 + $0x10f] sm:$0xff] }
  0x64   : > { %v1083_v49 = vmul.f32 %v1950_v27, %v1061_v62  ;;  %v931_v59 = vadd.f32 %v915_v10, %v875_v60  ;;  %v484_v40 = vmul.f32 %v1621_v16, %v1922_v50  ;;  %v524_v0 = vmul.f32 %v1626_v17, %v1928_v52  ;;  %v2090_v7 = vld [vmem:[#allocation2 + $0x110] sm:$0xff] }
  0x65   : > { %1136 = vst.msk [vmem:[%s1988_s16 + $0x30] sm:$0xff] %vm404_vm1, %v1120_v31  ;;  %v1016_v13 = vmul.f32 %v1000_v36, %v2027_v5  ;;  %v860_v41 = vmul.f32 %v1672_v24, %v2059_v15  ;;  %v580_v57 = vmul.f32 %v1631_v18, %v1915_v42  ;;  %v707_v46 = vadd.f32 %v691_v30, %v651_v6  ;;  %v893_v2 = vld [vmem:[#allocation2 + $0x111] sm:$0xff] }
  0x66   : > { %v1105_v14 = vadd.f32 %v1966_v48, %v1083_v49  ;;  %v2074_v63 = vadd.f32 %v1807_v3, %v931_v59  ;;  %v540_v55 = vadd.f32 %v524_v0, %v484_v40  ;;  %v636_v50 = vmul.f32 %v1641_v20, %v2023_v28 }
  0x67   : > { %1425 = vtanh.f32 %v1016_v13  ;;  %v916_v1 = vmul.f32 %v1677_v25, %v892_v54  ;;  %v692_v12 = vmul.f32 %v1646_v21, %v2037_v44  ;;  %v763_v42 = vadd.f32 %v747_v43, %v707_v46  ;;  %v782_v13 = vld [vmem:[#allocation2 + $0x127] sm:$0xff] }
  0x68   : > { %v1422_v56 = vpop.eup %1421  ;;  %v1121_v26 = vadd.f32 %v1105_v14, %v1786_v38  ;;  %v969_v8 = vmul.f32 %v2074_v63, %v2074_v63  ;;  %v596_v58 = vadd.f32 %v580_v57, %v540_v55  ;;  %v748_v53 = vmul.f32 %v1658_v22, %v2039_v47 }
  0x69   : > { %v1046_v61 = vadd.f32 1.0, %v1422_v56  ;;  %v805_v32 = vmul.f32 %v1663_v23, %v781_v33  ;;  %v485_v62 = vmul.f32 %v1621_v16, %v1956_v19  ;;  %v525_v60 = vmul.f32 %v1626_v17, %v1961_v51 }
  0x6a   : > { %1137 = vst.msk [vmem:[%s1988_s16 + $0x38] sm:$0xff] %vm404_vm1, %v1121_v26  ;;  %v985_v38 = vmul.f32 0.035677407, %v969_v8  ;;  %v820_v31 = vadd.f32 %v804_v34, %v763_v42  ;;  %v652_v36 = vadd.f32 %v636_v50, %v596_v58  ;;  %v581_v11 = vmul.f32 %v1631_v18, %v1945_v4  ;;  %v894_v42 = vld [vmem:[#allocation2 + $0x129] sm:$0xff] }
  0x6b   : > { %v1062_v10 = vmul.f32 %v1046_v61, %v1975_v35  ;;  %v861_v49 = vmul.f32 %v1672_v24, %v2090_v7  ;;  %v541_v59 = vadd.f32 %v525_v60, %v485_v62  ;;  %v637_v43 = vmul.f32 %v1641_v20, %v780_v37 }
  0x6c   : > { %v1001_v30 = vadd.f32 0.7978846, %v985_v38  ;;  %v876_v6 = vadd.f32 %v860_v41, %v820_v31  ;;  %v708_v40 = vadd.f32 %v692_v12, %v652_v36  ;;  %v917_v0 = vmul.f32 %v1677_v25, %v893_v2  ;;  %v838_v41 = vld [vmem:[#allocation2 + $0x128] sm:$0xff] }
  0x6d   : > { %v1084_v19 = vmul.f32 %v1950_v27, %v1062_v10  ;;  %v597_v34 = vadd.f32 %v581_v11, %v541_v59  ;;  %v693_v4 = vmul.f32 %v1646_v21, %v2059_v15  ;;  %v749_v14 = vmul.f32 %v1658_v22, %v892_v54  ;;  %v783_v10 = vld [vmem:[#allocation2 + $0x12f] sm:$0xff] }
  0x6e   : > { %v1017_v35 = vmul.f32 %v1001_v30, %v2074_v63  ;;  %v932_v55 = vadd.f32 %v916_v1, %v876_v6  ;;  %v764_v37 = vadd.f32 %v748_v53, %v708_v40  ;;  %v806_v50 = vmul.f32 %v1663_v23, %v782_v13  ;;  %v487_v6 = vld [vmem:[#allocation2 + $0x8] sm:$0xff] }
  0x6f   : > { %v1424_v57 = vpop.eup %1423  ;;  %v1106_v46 = vadd.f32 %v1966_v48, %v1084_v19  ;;  %v653_v26 = vadd.f32 %v637_v43, %v597_v34  ;;  %v486_v8 = vmul.f32 %v1621_v16, %v2023_v28  ;;  %v526_v1 = vmul.f32 %v1626_v17, %v2037_v44  ;;  %v448_v19 = vld [vmem:[#allocation2 + $0x7] sm:$0xff] }
  0x70   : > { %v1047_v56 = vadd.f32 1.0, %v1424_v57  ;;  %1427 = vtanh.f32 %v1017_v35  ;;  %v2117_v61 = vadd.f32 %v1807_v3, %v932_v55  ;;  %v821_v54 = vadd.f32 %v805_v32, %v764_v37 }
  0x71   : > { %v1122_v12 = vadd.f32 %v1106_v46, %v1820_v29  ;;  %v709_v53 = vadd.f32 %v693_v4, %v653_v26  ;;  %v862_v38 = vmul.f32 %v1672_v24, %v838_v41  ;;  %v582_v62 = vmul.f32 %v1631_v18, %v2039_v47  ;;  %v839_v46 = vld [vmem:[#allocation2 + $0x130] sm:$0xff] }
  0x72   : > { %v1063_v58 = vmul.f32 %v1047_v56, %v2006_v45  ;;  %v970_v29 = vmul.f32 %v2117_v61, %v2117_v61  ;;  %v877_v28 = vadd.f32 %v861_v49, %v821_v54  ;;  %v542_v60 = vadd.f32 %v526_v1, %v486_v8  ;;  %v599_v8 = vld [vmem:[#allocation2 + $0x27] sm:$0xff] }
  0x73   : > { %1138 = vst.msk [vmem:[%s1988_s16 + $0x40] sm:$0xff] %vm404_vm1, %v1122_v12  ;;  %v638_v32 = vmul.f32 %v1641_v20, %v781_v33  ;;  %v765_v45 = vadd.f32 %v749_v14, %v709_v53  ;;  %v918_v11 = vmul.f32 %v1677_v25, %v894_v42  ;;  %v694_v30 = vmul.f32 %v1646_v21, %v2090_v7 }
  0x74   : > { %v1426_v31 = vpop.eup %1425  ;;  %v1085_v36 = vmul.f32 %v1950_v27, %v1063_v58  ;;  %v986_v59 = vmul.f32 0.035677407, %v970_v29  ;;  %v933_v43 = vadd.f32 %v917_v0, %v877_v28  ;;  %v598_v13 = vadd.f32 %v582_v62, %v542_v60  ;;  %v543_v0 = vld [vmem:[#allocation2 + $0x9] sm:$0xff] }
  0x75   : > { %v1048_v47 = vadd.f32 1.0, %v1426_v31  ;;  %v822_v40 = vadd.f32 %v806_v50, %v765_v45  ;;  %v750_v33 = vmul.f32 %v1658_v22, %v893_v2  ;;  %v807_v35 = vmul.f32 %v1663_v23, %v783_v10  ;;  %v2153_v62 = vld [vmem:[#allocation2 + $0x28] sm:$0xff] }
  0x76   : > { %v1107_v49 = vadd.f32 %v1966_v48, %v1085_v36  ;;  %v1002_v4 = vadd.f32 0.7978846, %v986_v59  ;;  %v2139_v14 = vadd.f32 %v1807_v3, %v933_v43  ;;  %v654_v57 = vadd.f32 %v638_v32, %v598_v13  ;;  %v711_v32 = vld [vmem:[#allocation2 + $0x29] sm:$0xff] }
  0x77   : > { %v1064_v34 = vmul.f32 %v1048_v47, %v2027_v5  ;;  %v878_v37 = vadd.f32 %v862_v38, %v822_v40  ;;  %v471_v41 = vmul.f32 %v1621_v16, %v448_v19  ;;  %v511_v50 = vmul.f32 %v1626_v17, %v487_v6  ;;  %v449_v10 = vld [vmem:[#allocation2 + $0xf] sm:$0xff]  ;;  %v768_v6 = vld [vmem:[#allocation2 + $0x47] sm:$0xff] }
  0x78   : > { %v1123_v55 = vadd.f32 %v1107_v49, %v1861_v39  ;;  %v1018_v56 = vmul.f32 %v1002_v4, %v2117_v61  ;;  %v971_v5 = vmul.f32 %v2139_v14, %v2139_v14  ;;  %v710_v26 = vadd.f32 %v694_v30, %v654_v57  ;;  %v895_v39 = vld [vmem:[#allocation2 + $0x131] sm:$0xff] }
  0x79   : > { %v1086_v2 = vmul.f32 %v1950_v27, %v1064_v34  ;;  %v934_v12 = vadd.f32 %v918_v11, %v878_v37  ;;  %v863_v54 = vmul.f32 %v1672_v24, %v839_v46  ;;  %v527_v42 = vadd.f32 %v511_v50, %v471_v41  ;;  %v488_v47 = vld [vmem:[#allocation2 + $0x10] sm:$0xff]  ;;  %v824_v46 = vld [vmem:[#allocation2 + $0x48] sm:$0xff] }
  0x7a   : > { %1139 = vst.msk [vmem:[%s1988_s16 + $0x48] sm:$0xff] %vm404_vm1, %v1123_v55  ;;  %v567_v1 = vmul.f32 %v1631_v18, %v543_v0  ;;  %1429 = vtanh.f32 %v1018_v56  ;;  %v987_v53 = vmul.f32 0.035677407, %v971_v5  ;;  %v766_v38 = vadd.f32 %v750_v33, %v710_v26  ;;  %v544_v49 = vld [vmem:[#allocation2 + $0x11] sm:$0xff]  ;;  %v880_v5 = vld [vmem:[#allocation2 + $0x49] sm:$0xff] }
  0x7b   : > { %v1108_v58 = vadd.f32 %v1966_v48, %v1086_v2  ;;  %v2156_v29 = vadd.f32 %v1807_v3, %v934_v12  ;;  %v623_v60 = vmul.f32 %v1641_v20, %v599_v8  ;;  %v919_v30 = vmul.f32 %v1677_v25, %v895_v39  ;;  %v600_v55 = vld [vmem:[#allocation2 + $0x2f] sm:$0xff] }
  0x7c   : > { %v583_v28 = vadd.f32 %v567_v1, %v527_v42  ;;  %v1003_v45 = vadd.f32 0.7978846, %v987_v53  ;;  %v823_v11 = vadd.f32 %v807_v35, %v766_v38  ;;  %v679_v19 = vmul.f32 %v1646_v21, %v2153_v62  ;;  %v2175_v26 = vld [vmem:[#allocation2 + $0x30] sm:$0xff] }
  0x7d   : > { %v1428_v31 = vpop.eup %1427  ;;  %v1124_v36 = vadd.f32 %v1108_v58, %v1898_v9  ;;  %v972_v43 = vmul.f32 %v2156_v29, %v2156_v29  ;;  %v735_v33 = vmul.f32 %v1658_v22, %v711_v32  ;;  %v472_v35 = vmul.f32 %v1621_v16, %v449_v10  ;;  %v712_v58 = vld [vmem:[#allocation2 + $0x31] sm:$0xff] }
  0x7e   : > { %v1049_v59 = vadd.f32 1.0, %v1428_v31  ;;  %v639_v13 = vadd.f32 %v623_v60, %v583_v28  ;;  %v1019_v40 = vmul.f32 %v1003_v45, %v2139_v14  ;;  %v879_v9 = vadd.f32 %v863_v54, %v823_v11  ;;  %v769_v28 = vld [vmem:[#allocation2 + $0x4f] sm:$0xff] }
  0x7f   : > { %1140 = vst.msk [vmem:[%s1988_s16 + $0x50] sm:$0xff] %vm404_vm1, %v1124_v36  ;;  %v988_v4 = vmul.f32 0.035677407, %v972_v43  ;;  %v512_v0 = vmul.f32 %v1626_v17, %v488_v47  ;;  %v792_v41 = vmul.f32 %v1663_v23, %v768_v6  ;;  %v568_v50 = vmul.f32 %v1631_v18, %v544_v49  ;;  %v825_v45 = vld [vmem:[#allocation2 + $0x50] sm:$0xff]  ;;  %v1443_v49 = vld [vmem:[%s2259_s3 + $0x7] ss:$0 sm:$0xff] }
  0x80   : > { %v1065_v34 = vmul.f32 %v1049_v59, %v2074_v63  ;;  %v695_v57 = vadd.f32 %v679_v19, %v639_v13  ;;  %1431 = vtanh.f32 %v1019_v40  ;;  %v935_v37 = vadd.f32 %v919_v30, %v879_v9  ;;  %v1442_v30 = vld [vmem:[%s2259_s3 + $0x6] ss:$0 sm:$0xff]  ;;  %v881_v13 = vld [vmem:[#allocation2 + $0x51] sm:$0xff] }
  0x81   : > { %v1004_v56 = vadd.f32 0.7978846, %v988_v4  ;;  %v528_v16 = vadd.f32 %v512_v0, %v472_v35  ;;  %v848_v17 = vmul.f32 %v1672_v24, %v824_v46  ;;  %v624_v8 = vmul.f32 %v1641_v20, %v600_v55 }
  0x82   : > { %v1087_v2 = vmul.f32 %v1950_v27, %v1065_v34  ;;  %v751_v22 = vadd.f32 %v735_v33, %v695_v57  ;;  %v2178_v63 = vadd.f32 %v1807_v3, %v935_v37  ;;  %v904_v42 = vmul.f32 %v1677_v25, %v880_v5  ;;  %v1441_v25 = vld [vmem:[%s2259_s3 + $0x5] ss:$0 sm:$0xff] }
  0x83   : > { %v1020_v18 = vmul.f32 %v1004_v56, %v2156_v29  ;;  %v584_v54 = vadd.f32 %v568_v50, %v528_v16  ;;  %v680_v1 = vmul.f32 %v1646_v21, %v2175_v26  ;;  %v736_v31 = vmul.f32 %v1441_v25, %v712_v58 }
  0x84   : > { %v1109_v23 = vadd.f32 %v1966_v48, %v1087_v2  ;;  %v808_v12 = vadd.f32 %v792_v41, %v751_v22  ;;  %v973_v39 = vmul.f32 %v2178_v63, %v2178_v63  ;;  %v793_v47 = vmul.f32 %v1442_v30, %v769_v28 }
  0x85   : > { %1433 = vtanh.f32 %v1020_v18  ;;  %v640_v53 = vadd.f32 %v624_v8, %v584_v54  ;;  %v849_v40 = vmul.f32 %v1443_v49, %v825_v45 }
  0x86   : > { %v1125_v24 = vadd.f32 %v1109_v23, %v1928_v52  ;;  %v864_v20 = vadd.f32 %v848_v17, %v808_v12  ;;  %v989_v38 = vmul.f32 0.035677407, %v973_v39 }
  0x87   : > { %v1430_v60 = vpop.eup %1429  ;;  %v696_v10 = vadd.f32 %v680_v1, %v640_v53 }
  0x88   : > { %1141 = vst.msk [vmem:[%s1988_s16 + $0x58] sm:$0xff] %vm404_vm1, %v1125_v24  ;;  %v920_v32 = vadd.f32 %v904_v42, %v864_v20  ;;  %v1050_v36 = vadd.f32 1.0, %v1430_v60  ;;  %v1005_v21 = vadd.f32 0.7978846, %v989_v38 }
  0x89   : > { %v752_v11 = vadd.f32 %v736_v31, %v696_v10 }
  0x8a   : > { %v942_v52 = vadd.f32 %v1807_v3, %v920_v32  ;;  %v1066_v59 = vmul.f32 %v1050_v36, %v2117_v61  ;;  %v1021_v43 = vmul.f32 %v1005_v21, %v2178_v63  ;;  %v1444_v61 = vld [vmem:[%s2259_s3 + $0x8] ss:$0 sm:$0xff] }
  0x8b   : > { %v809_v6 = vadd.f32 %v793_v47, %v752_v11  ;;  %v905_v4 = vmul.f32 %v1444_v61, %v881_v13 }
  0x8c   : > { %v958_v19 = vmul.f32 %v942_v52, %v942_v52  ;;  %v1088_v9 = vmul.f32 %v1950_v27, %v1066_v59  ;;  %1435 = vtanh.f32 %v1021_v43 }
  0x8d   : > { %v1432_v33 = vpop.eup %1431  ;;  %v865_v34 = vadd.f32 %v849_v40, %v809_v6 }
  0x8e   : > { %v974_v35 = vmul.f32 0.035677407, %v958_v19  ;;  %v1110_v57 = vadd.f32 %v1966_v48, %v1088_v9  ;;  %v1051_v46 = vadd.f32 1.0, %v1432_v33 }
  0x8f   : > { %v921_v55 = vadd.f32 %v905_v4, %v865_v34 }
  0x90   : > { %v990_v0 = vadd.f32 0.7978846, %v974_v35  ;;  %v1126_v37 = vadd.f32 %v1110_v57, %v1961_v51  ;;  %v1067_v41 = vmul.f32 %v1051_v46, %v2139_v14 }
  0x91   : > { %v943_v2 = vadd.f32 %v1807_v3, %v921_v55 }
  0x92   : > { %v1006_v50 = vmul.f32 %v990_v0, %v942_v52  ;;  %v1434_v56 = vpop.eup %1433  ;;  %1142 = vst.msk [vmem:[%s1988_s16 + $0x60] sm:$0xff] %vm404_vm1, %v1126_v37  ;;  %v1089_v22 = vmul.f32 %v1950_v27, %v1067_v41 }
  0x93   : > { %v1052_v5 = vadd.f32 1.0, %v1434_v56  ;;  %v959_v16 = vmul.f32 %v943_v2, %v943_v2 }
  0x94   : > { %1437 = vtanh.f32 %v1006_v50  ;;  %v1111_v17 = vadd.f32 %v1966_v48, %v1089_v22 }
  0x95   : > { %v1068_v8 = vmul.f32 %v1052_v5, %v2156_v29  ;;  %v975_v51 = vmul.f32 0.035677407, %v959_v16 }
  0x96   : > { %v1127_v23 = vadd.f32 %v1111_v17, %v2037_v44 }
  0x97   : > { %v1090_v14 = vmul.f32 %v1950_v27, %v1068_v8  ;;  %v991_v18 = vadd.f32 0.7978846, %v975_v51 }
  0x98   : > { %1143 = vst.msk [vmem:[%s1988_s16 + $0x68] sm:$0xff] %vm404_vm1, %v1127_v23 }
  0x99   : > { %v1436_v3 = vpop.eup %1435  ;;  %v1112_v12 = vadd.f32 %v1966_v48, %v1090_v14  ;;  %v1007_v54 = vmul.f32 %v991_v18, %v943_v2 }
  0x9a   : > { %v1053_v39 = vadd.f32 1.0, %v1436_v3 }
  0x9b   : > { %v1128_v42 = vadd.f32 %v1112_v12, %v2059_v15  ;;  %1439 = vtanh.f32 %v1007_v54 }
  0x9c   : > { %v1069_v29 = vmul.f32 %v1053_v39, %v2178_v63 }
  0x9d   : > { %1144 = vst.msk [vmem:[%s1988_s16 + $0x70] sm:$0xff] %vm404_vm1, %v1128_v42 }
  0x9e   : > { %v1091_v44 = vmul.f32 %v1950_v27, %v1069_v29 }
  0xa0   : > { %v1113_v58 = vadd.f32 %v1966_v48, %v1091_v44 }
  0xa1   : > { %v1438_v1 = vpop.eup %1437 }
  0xa2   : > { %v1038_v24 = vadd.f32 1.0, %v1438_v1  ;;  %v1129_v20 = vadd.f32 %v1113_v58, %v2090_v7 }
  0xa4   : > { %v1054_v53 = vmul.f32 %v1038_v24, %v942_v52  ;;  %1145 = vst.msk [vmem:[%s1988_s16 + $0x78] sm:$0xff] %vm404_vm1, %v1129_v20 }
  0xa6   : > { %v1076_v15 = vmul.f32 %v1950_v27, %v1054_v53 }
  0xa8   : > { %v1098_v38 = vadd.f32 %v1966_v48, %v1076_v15  ;;  %v1440_v28 = vpop.eup %1439 }
  0xa9   : > { %v1039_v60 = vadd.f32 1.0, %v1440_v28 }
  0xaa   : > { %v1114_v63 = vadd.f32 %v1098_v38, %v2153_v62 }
  0xab   : > { %v1055_v32 = vmul.f32 %v1039_v60, %v943_v2 }
  0xac   : > { %1130 = vst.msk [vmem:[%s1988_s16] sm:$0xff] %vm404_vm1, %v1114_v63 }
  0xad   : > { %v1077_v10 = vmul.f32 %v1950_v27, %v1055_v32 }
  0xaf   : > { %v1099_v25 = vadd.f32 %v1966_v48, %v1077_v10 }
  0xb1   : > { %v1115_v7 = vadd.f32 %v1099_v25, %v2175_v26 }
  0xb3   : > { %1131 = vst.msk [vmem:[%s1988_s16 + $0x8] sm:$0xff] %vm404_vm1, %v1115_v7 }
  0xb4 PF: > { %s14_s19 = sadd.s32 1, %s1483_s19   ;;  %s2262_s15 = smov %s1475_s17 }
  0xb5   : > { %p11_p12 = scmp.ge.s32.totalorder %s14_s19, 6   ;;  %s2263_s16 = smov %s1479_s18 }
  0xb6   : > { %s2264_s17 = smov %s2267_s20  ;;  %s2265_s18 = smov %s2271_s21 }
  0xb7   :  { %13 = sbr.rel (!%p11_p12) target bundleno = 3 (0x3), region = 86 }

</bundles_post_ra>
